<compile_context>
chip_gen: v7x
topology: tpu7x:2x2x1
jax: 0.10.0
libtpu: 0.0.40
codegen_flags: <defaults>
</compile_context>

<pallas_src>
import functools

import jax
import jax.numpy as jnp
from jax.experimental import pallas as pl
from jax.experimental.pallas import tpu as pltpu

_ITEM = 4  # f32 bytes
_GATE_ORDER = (0, 1, 3, 2)  # dst block -> src PyTorch gate index (i, f, g, o)


def _round_up(x, m):
    return (x + m - 1) // m * m


def _pick_chunk(T, bp, d_in_max, hp, vmem_budget_bytes, tc_cap=64):
    """Largest divisor of T whose chunk fits the VMEM budget (<= tc_cap)."""
    fixed = _ITEM * (2 * max(d_in_max, hp) * 4 * hp + 4 * bp * hp)  # weights + cn + h/c
    # Double-buffered streamed blocks per timestep of a chunk (conservatively
    # the sum of the projection call and recurrence call needs).
    per_t = _ITEM * bp * (2 * d_in_max + 2 * 4 * hp + 2 * 4 * hp + 2 * hp)
    tc_max = int(min(max(1, (vmem_budget_bytes - fixed) // per_t), T, tc_cap))
    for d in range(tc_max, 0, -1):
        if T % d == 0:
            return d
    return 1


def _vmem_limit(need_bytes):
    # Explicit scoped-VMEM limit: computed need + headroom, clamped to a value
    # that is safe on v5e/v6e (128 MiB phys) and v7x (64 MiB phys).
    return int(min(max(int(need_bytes * 1.5) + (4 << 20), 16 << 20), 32 << 20))


# ----------------------------------------------------------------------------
# Kernel 1: hoisted input projection  gx = relu?(x) @ W_ih^T + (b_ih + b_hh)
# ----------------------------------------------------------------------------
def _proj_kernel(x_ref, wih_ref, b_ref, gx_ref, *, apply_relu):
    x = x_ref[0]                                    # (tc*bp, D_in)
    if apply_relu:
        x = jnp.maximum(x, 0.0)
    gx_ref[0] = (jnp.dot(x, wih_ref[...], preferred_element_type=jnp.float32)
                 + b_ref[...])


def _run_input_projection(x_chunks, wih, bias, *, apply_relu):
    nc, tb, d_in = x_chunks.shape
    g4 = wih.shape[1]
    need = _ITEM * (2 * tb * d_in + 2 * tb * g4 + 2 * d_in * g4 + 2 * g4)
    return pl.pallas_call(
        functools.partial(_proj_kernel, apply_relu=apply_relu),
        out_shape=jax.ShapeDtypeStruct((nc, tb, g4), jnp.float32),
        grid_spec=pltpu.PrefetchScalarGridSpec(
            num_scalar_prefetch=0,
            grid=(nc,),
            in_specs=[
                pl.BlockSpec((1, tb, d_in), lambda c: (c, 0, 0)),  # x chunk
                pl.BlockSpec((d_in, g4), lambda c: (0, 0)),        # W_ih^T (resident)
                pl.BlockSpec((1, g4), lambda c: (0, 0)),           # fused bias
            ],
            out_specs=pl.BlockSpec((1, tb, g4), lambda c: (c, 0, 0)),
        ),
        compiler_params=pltpu.CompilerParams(
            dimension_semantics=("parallel",),
            vmem_limit_bytes=_vmem_limit(need)),
    )(x_chunks, wih, bias)


# ----------------------------------------------------------------------------
# Kernel 2: serial LSTM recurrence over a time-chunk (gx streamed from kernel 1)
# ----------------------------------------------------------------------------
def _lstm_recurrence_kernel(gx_ref, whh_ref, y_ref, cn_ref, h_sc, c_sc,
                            *, hp, tc, bp, unroll):
    """gx_ref: (1, tc*bp, 4*hp); whh_ref: (hp, 4*hp); y_ref: (1, tc*bp, hp);
    cn_ref: (bp, hp); h_sc/c_sc: (bp, hp) f32 carries across chunks."""
    ci = pl.program_id(0)

    @pl.when(ci == 0)
    def _():
        h_sc[...] = jnp.zeros_like(h_sc)
        c_sc[...] = jnp.zeros_like(c_sc)

    whh = whh_ref[...]

    def step(t, carry):
        h, c = carry
        row = pl.multiple_of(t * bp, bp)
        gates = gx_ref[0, pl.ds(row, bp), :] + jnp.dot(
            h, whh, preferred_element_type=jnp.float32)
        # Gate layout [i, f, o | g]: one fused sigmoid slab + one tanh.
        sig = jax.nn.sigmoid(gates[:, :3 * hp])
        g_g = jnp.tanh(gates[:, 3 * hp:])
        i_g = sig[:, 0 * hp:1 * hp]
        f_g = sig[:, 1 * hp:2 * hp]
        o_g = sig[:, 2 * hp:3 * hp]
        c = f_g * c + i_g * g_g
        h = o_g * jnp.tanh(c)
        y_ref[0, pl.ds(row, bp), :] = h.astype(y_ref.dtype)
        return h, c

    h, c = jax.lax.fori_loop(0, tc, step, (h_sc[...], c_sc[...]), unroll=unroll)
    h_sc[...] = h
    c_sc[...] = c

    @pl.when(ci == pl.num_programs(0) - 1)
    def _():
        cn_ref[...] = c.astype(cn_ref.dtype)


def _run_lstm_recurrence(gx_chunks, whh, *, hp, tc, bp):
    nc, tb, g4 = gx_chunks.shape
    need = _ITEM * (2 * tb * g4 + 2 * tb * hp + 2 * hp * g4 + 4 * bp * hp)
    kernel = functools.partial(_lstm_recurrence_kernel, hp=hp, tc=tc, bp=bp,
                               unroll=int(min(tc, 8)))
    y, cn = pl.pallas_call(
        kernel,
        out_shape=(
            jax.ShapeDtypeStruct((nc, tb, hp), jnp.float32),   # per-step hidden
            jax.ShapeDtypeStruct((bp, hp), jnp.float32),       # c_T
        ),
        grid_spec=pltpu.PrefetchScalarGridSpec(
            num_scalar_prefetch=0,
            grid=(nc,),
            in_specs=[
                pl.BlockSpec((1, tb, g4), lambda c: (c, 0, 0)),  # gx chunk
                pl.BlockSpec((hp, g4), lambda c: (0, 0)),        # W_hh^T (resident)
            ],
            out_specs=[
                pl.BlockSpec((1, tb, hp), lambda c: (c, 0, 0)),
                pl.BlockSpec((bp, hp), lambda c: (0, 0)),
            ],
            scratch_shapes=[
                pltpu.VMEM((bp, hp), jnp.float32),   # h carry
                pltpu.VMEM((bp, hp), jnp.float32),   # c carry
            ],
        ),
        compiler_params=pltpu.CompilerParams(
            dimension_semantics=("arbitrary",),      # sequential recurrence
            vmem_limit_bytes=_vmem_limit(need)),
    )(gx_chunks, whh)
    return y, cn


# ----------------------------------------------------------------------------
# Parameter preparation / forward wrapper
# ----------------------------------------------------------------------------
def prepare_kernel_params(raw_params, input_dim, num_hiddens):
    """Pad/transpose PyTorch-style LSTM weights for the kernels.

    Each gate gets a lane-aligned hp-wide block in order [i, f, o, g]; padded
    rows/cols/bias lanes are exactly zero (required for padded h/c to stay 0).
    """
    H = num_hiddens
    hp = _round_up(H, 128)
    kparams = []
    for li, (w_ih, w_hh, b_ih, b_hh) in enumerate(raw_params):
        d_in = input_dim if li == 0 else H
        d_in_p = input_dim if li == 0 else hp     # layer >0 consumes padded y
        wih_p = jnp.zeros((d_in_p, 4 * hp), jnp.float32)
        whh_p = jnp.zeros((hp, 4 * hp), jnp.float32)
        b_p = jnp.zeros((1, 4 * hp), jnp.float32)
        b_fused = b_ih + b_hh
        for dst, src in enumerate(_GATE_ORDER):
            wih_p = wih_p.at[:d_in, dst * hp:dst * hp + H].set(
                w_ih[src * H:(src + 1) * H, :].T)
            whh_p = whh_p.at[:H, dst * hp:dst * hp + H].set(
                w_hh[src * H:(src + 1) * H, :].T)
            b_p = b_p.at[0, dst * hp:dst * hp + H].set(b_fused[src * H:(src + 1) * H])
        kparams.append((wih_p, whh_p, b_p))
    return kparams


def encoder_forward(x_btd, kparams, *, num_hiddens, vmem_budget_bytes=12 << 20):
    """PyTorch-equivalent forward: ReLU -> multi-layer LSTM (batch_first).

    Returns output (B, T, H) and (h_n, c_n), each (num_layers, B, H).
    """
    B, T, D = x_btd.shape
    H = num_hiddens
    hp = _round_up(H, 128)
    bp = _round_up(B, 8)
    d_in_max = max(D, hp) if len(kparams) > 1 else D
    tc = _pick_chunk(T, bp, d_in_max, hp, vmem_budget_bytes)
    nc = T // tc

    # Time-major, pad batch to a sublane multiple, fold (tc, bp) chunks.
    x = jnp.transpose(x_btd, (1, 0, 2))                    # (T, B, D)
    x = jnp.pad(x, ((0, 0), (0, bp - B), (0, 0)))          # (T, bp, D)
    x = x.reshape(nc, tc * bp, D)

    hs, cs = [], []
    inp = x
    for li, (wih, whh, bias) in enumerate(kparams):
        gx = _run_input_projection(inp, wih, bias, apply_relu=(li == 0))
        y, cn = _run_lstm_recurrence(gx, whh, hp=hp, tc=tc, bp=bp)
        # h_n of this layer == hidden output at the last timestep of y.
        hs.append(y[-1, (tc - 1) * bp:(tc - 1) * bp + B, :H])
        cs.append(cn[:B, :H])
        inp = y                                            # stays in kernel layout

    y_full = inp.reshape(T, bp, hp)[:, :B, :H]             # strip padding
    output = jnp.transpose(y_full, (1, 0, 2))              # back to (B, T, H)
    return output, (jnp.stack(hs, axis=0), jnp.stack(cs, axis=0))


# ----------------------------------------------------------------------------
# Reference / demo
# ----------------------------------------------------------------------------
def init_raw_params(key, input_dim, num_hiddens, num_layers):
    """PyTorch-style LSTM params, uniform(-1/sqrt(H), 1/sqrt(H))."""
    params = []
    bound = 1.0 / jnp.sqrt(jnp.float32(num_hiddens))
    for l in range(num_layers):
        d_in = input_dim if l == 0 else num_hiddens
        key, k1, k2, k3, k4 = jax.random.split(key, 5)
        w_ih = jax.random.uniform(k1, (4 * num_hiddens, d_in), jnp.float32, -bound, bound)
        w_hh = jax.random.uniform(k2, (4 * num_hiddens, num_hiddens), jnp.float32, -bound, bound)
        b_ih = jax.random.uniform(k3, (4 * num_hiddens,), jnp.float32, -bound, bound)
        b_hh = jax.random.uniform(k4, (4 * num_hiddens,), jnp.float32, -bound, bound)
        params.append((w_ih, w_hh, b_ih, b_hh))
    return params


def encoder_reference(x_btd, raw_params):
    """Pure-JAX reference (lax.scan) mirroring PyTorch LSTM eval semantics."""
    B = x_btd.shape[0]
    inp = jnp.transpose(jnp.maximum(x_btd, 0.0), (1, 0, 2))   # (T, B, D)
    hs, cs = [], []
    for (w_ih, w_hh, b_ih, b_hh) in raw_params:
        H = w_hh.shape[1]
        wihT, whhT, b = w_ih.T, w_hh.T, b_ih + b_hh

        def step(carry, xt, wihT=wihT, whhT=whhT, b=b, H=H):
            h, c = carry
            g = xt @ wihT + h @ whhT + b
            i = jax.nn.sigmoid(g[:, 0 * H:1 * H])
            f = jax.nn.sigmoid(g[:, 1 * H:2 * H])
            gg = jnp.tanh(g[:, 2 * H:3 * H])
            o = jax.nn.sigmoid(g[:, 3 * H:4 * H])
            c = f * c + i * gg
            h = o * jnp.tanh(c)
            return (h, c), h

        init = (jnp.zeros((B, H), jnp.float32), jnp.zeros((B, H), jnp.float32))
        (hT, cT), ys = jax.lax.scan(step, init, inp)
        inp = ys
        hs.append(hT)
        cs.append(cT)
    return jnp.transpose(inp, (1, 0, 2)), (jnp.stack(hs), jnp.stack(cs))


if __name__ == "__main__":
    B, T = 2, 8
    input_dim, num_hiddens, num_layers = 4, 32, 2

    key = jax.random.PRNGKey(0)
    kx, kp = jax.random.split(key)
    x = jax.random.normal(kx, (B, T, input_dim), jnp.float32)

    raw_params = init_raw_params(kp, input_dim, num_hiddens, num_layers)
    kparams = prepare_kernel_params(raw_params, input_dim, num_hiddens)

    out, (h_n, c_n) = jax.block_until_ready(
        encoder_forward(x, kparams, num_hiddens=num_hiddens))

    # sanity check vs pure-JAX reference
    ref_out, (ref_h, ref_c) = encoder_reference(x, raw_params)
    assert out.shape == (B, T, num_hiddens)
    assert h_n.shape == (num_layers, B, num_hiddens)
    assert c_n.shape == (num_layers, B, num_hiddens)
    assert jnp.allclose(out, ref_out, atol=1e-4), float(jnp.abs(out - ref_out).max())
    assert jnp.allclose(h_n, ref_h, atol=1e-4), float(jnp.abs(h_n - ref_h).max())
    assert jnp.allclose(c_n, ref_c, atol=1e-4), float(jnp.abs(c_n - ref_c).max())

    print("KERNEL_OK")
</pallas_src>

<mosaic_0001>
module attributes {stable_mosaic.version = 11 : i64} {
  func.func @_proj_kernel(%arg0: i32, %arg1: memref<1x64x4xf32, #tpu.memory_space<vmem>>, %arg2: memref<4x512xf32, #tpu.memory_space<vmem>>, %arg3: memref<1x512xf32, #tpu.memory_space<vmem>>, %arg4: memref<1x64x512xf32, #tpu.memory_space<vmem>>) attributes {dimension_semantics = [#tpu.dimension_semantics<parallel>], iteration_bounds = array<i64: 1>, scalar_prefetch = 0 : i64, scratch_operands = 0 : i64, tpu.core_type = #tpu.core_type<tc>, window_params = [{transform_indices = @transform_0, window_bounds = array<i64: 1, 64, 4>}, {pipeline_mode = #tpu.pipeline_mode<synchronous>, transform_indices = @transform_1, window_bounds = array<i64: 4, 512>}, {pipeline_mode = #tpu.pipeline_mode<synchronous>, transform_indices = @transform_2, window_bounds = array<i64: 1, 512>}, {transform_indices = @transform_3, window_bounds = array<i64: 1, 64, 512>}]} {
    %c0 = arith.constant 0 : index
    %c0_0 = arith.constant 0 : index
    %c0_1 = arith.constant 0 : index
    %0 = vector.load %arg1[%c0, %c0_0, %c0_1] : memref<1x64x4xf32, #tpu.memory_space<vmem>>, vector<1x64x4xf32>
    %1 = vector.shape_cast %0 : vector<1x64x4xf32> to vector<64x4xf32>
    %cst = arith.constant 0.000000e+00 : f32
    %2 = vector.broadcast %cst : f32 to vector<64x4xf32>
    %3 = arith.maximumf %1, %2 : vector<64x4xf32>
    %c0_2 = arith.constant 0 : index
    %c0_3 = arith.constant 0 : index
    %4 = vector.load %arg2[%c0_2, %c0_3] : memref<4x512xf32, #tpu.memory_space<vmem>>, vector<4x512xf32>
    %cst_4 = arith.constant dense<0.000000e+00> : vector<64x512xf32>
    %5 = tpu.matmul %3, %4, %cst_4 {dimension_numbers = #tpu.dot_dimension_numbers<[1], [0], [0], [1], [0, 0, 1, 1], [], []>} : vector<64x4xf32>, vector<4x512xf32>, vector<64x512xf32> -> vector<64x512xf32>
    %c0_5 = arith.constant 0 : index
    %c0_6 = arith.constant 0 : index
    %6 = vector.load %arg3[%c0_5, %c0_6] : memref<1x512xf32, #tpu.memory_space<vmem>>, vector<1x512xf32>
    %7 = vector.broadcast %6 : vector<1x512xf32> to vector<64x512xf32>
    %8 = arith.addf %5, %7 : vector<64x512xf32>
    %c0_7 = arith.constant 0 : index
    %c0_8 = arith.constant 0 : index
    %c0_9 = arith.constant 0 : index
    %9 = vector.load %arg4[%c0_7, %c0_8, %c0_9] : memref<1x64x512xf32, #tpu.memory_space<vmem>>, vector<1x64x512xf32>
    %10 = vector.shape_cast %9 : vector<1x64x512xf32> to vector<64x512xf32>
    %11 = vector.shape_cast %8 : vector<64x512xf32> to vector<1x64x512xf32>
    tpu.vector_store %arg4[%c0_7, %c0_8, %c0_9], %11 {strides = array<i32>} : memref<1x64x512xf32, #tpu.memory_space<vmem>>, vector<1x64x512xf32>,
    return
  }
  func.func @transform_0(%arg0: i32) -> (i32, i32, i32) {
    %c0_i32 = arith.constant 0 : i32
    %c0_i32_0 = arith.constant 0 : i32
    %c0_i32_1 = arith.constant 0 : i32
    return %arg0, %c0_i32, %c0_i32_0 : i32, i32, i32
  }
  func.func @transform_1(%arg0: i32) -> (i32, i32) {
    %c0_i32 = arith.constant 0 : i32
    %c0_i32_0 = arith.constant 0 : i32
    %c0_i32_1 = arith.constant 0 : i32
    return %c0_i32, %c0_i32_0 : i32, i32
  }
  func.func @transform_2(%arg0: i32) -> (i32, i32) {
    %c0_i32 = arith.constant 0 : i32
    %c0_i32_0 = arith.constant 0 : i32
    %c0_i32_1 = arith.constant 0 : i32
    return %c0_i32, %c0_i32_0 : i32, i32
  }
  func.func @transform_3(%arg0: i32) -> (i32, i32, i32) {
    %c0_i32 = arith.constant 0 : i32
    %c0_i32_0 = arith.constant 0 : i32
    %c0_i32_1 = arith.constant 0 : i32
    return %arg0, %c0_i32, %c0_i32_0 : i32, i32, i32
  }
}

</mosaic_0001>

<bundles_post_ra>
// kernel: tpu_custom_call.1
= control target key start
LH: loop header
LB: loop body
LE: loop exit
PB: predicated region body
PF: predicated region fallthrough
CT: control target
= control target key end

     0   :  { %vm84_vm0 = vcmask 1043456   ;;  %v417_v5 = vmov 0.0   ;;  %vm59_vm1 = vcmask 31744   ;;  %s542_s0 = inlined_call_operand.vmem [shape: f32[1,64,4], index: 0, kind: input, shape index: {}]   ;;  %s543_s1 = inlined_call_operand.vmem [shape: f32[4,512], index: 1, kind: input, shape index: {}]   ;;  %s544_s2 = inlined_call_operand.vmem [shape: f32[1,512], index: 2, kind: input, shape index: {}]   ;;  %s545_s3 = inlined_call_operand.hbm [shape: f32[1,64,512], index: 3, kind: output, shape index: {}]  }
   0x1   :  { %v31_v0 = vld [vmem:[%s543_s1] sm:$0xff]  ;;  %v32_v1 = vld [vmem:[%s543_s1 + $0x8] sm:$0xff]  ;;  %157 = vmatprep.mubr.f32.mxu0 %v417_v5  ;;  %270 = vmatprep.mubr.f32.mxu1 %v417_v5 }
   0x2   :  { %v15_v2 = vld [vmem:[%s542_s0] sm:$0xff]  ;;  %v57_v3 = vcombine.high %v31_v0, %v31_v0  ;;  %v58_v4 = vcombine.high %v32_v1, %v32_v1  ;;  %v16_v7 = vld [vmem:[%s542_s0 + $0x8] sm:$0xff] }
   0x3   :  { %v23_v6 = vmax.f32 %v15_v2, 0.0 }
   0x4   :  { %367 = vmatprep.subr.msk.mxu0 %vm84_vm0, %v57_v3  ;;  %377 = vmatprep.subr.msk.mxu1 %vm84_vm0, %v58_v4 }
   0x5   :  { %368 = vmatpush1.msk.msra.mxu0 %vm84_vm0, %v31_v0  ;;  %378 = vmatpush1.msk.msra.mxu1 %vm84_vm0, %v32_v1 }
   0x6   :  { %8 = vsyncpa [#allocation3], 0  ;;  %369 = vmatmul.mubr.msk.f32.vlgmr.msra.gmra.mrb[0].mxu0 %vm59_vm1, %v23_v6  ;;  %379 = vmatmul.mubr.msk.f32.vlgmr.msra.gmra.mrb[0].mxu1 %vm59_vm1, %v23_v6  ;;  %v24_v8 = vmax.f32 %v16_v7, 0.0  ;;  %v17_v9 = vld [vmem:[%s542_s0 + $0x10] sm:$0xff]  ;;  %v18_v11 = vld [vmem:[%s542_s0 + $0x18] sm:$0xff]  ;;  %v35_v21 = vlaneseq }
   0x7   :  { %163 = vmatprep.mubr.f32.mxu0 %v417_v5  ;;  %276 = vmatprep.mubr.f32.mxu1 %v417_v5  ;;  %v25_v10 = vmax.f32 %v17_v9, 0.0  ;;  %v26_v12 = vmax.f32 %v18_v11, 0.0  ;;  %v19_v13 = vld [vmem:[%s542_s0 + $0x20] sm:$0xff]  ;;  %v20_v15 = vld [vmem:[%s542_s0 + $0x28] sm:$0xff]  ;;  %v21_v17 = vld [vmem:[%s542_s0 + $0x30] sm:$0xff] }
   0x8   :  { %v27_v14 = vmax.f32 %v19_v13, 0.0  ;;  %v28_v16 = vmax.f32 %v20_v15, 0.0  ;;  %v29_v18 = vmax.f32 %v21_v17, 0.0  ;;  %v22_v19 = vld [vmem:[%s542_s0 + $0x38] sm:$0xff]  ;;  %v36_v22 = vshrl.u32 %v35_v21, 7  ;;  %s418_s0 = smov [#allocation2]  }
   0x9   :  { %v30_v20 = vmax.f32 %v22_v19, 0.0  ;;  %v33_v25 = vld [vmem:[%s544_s2] sm:$0xf]  ;;  %s356_s2 = sshll.u32 %s418_s0, 4  ;;  %s357_s2 = int_to_ptr.vmem [resolvable:$true] %s356_s2 }
   0xa   :  { %370 = vmatmul.mubr.msk.f32.gmra.mrb[2].mxu0 %vm59_vm1, %v24_v8  ;;  %380 = vmatmul.mubr.msk.f32.gmra.mrb[2].mxu1 %vm59_vm1, %v24_v8  ;;  %v37_v23 = vsub.s32 0, %v36_v22  ;;  %v45_v24 = vsub.s32 2, %v36_v22  ;;  %v41_v26 = vsub.s32 1, %v36_v22  ;;  %v49_v27 = vsub.s32 3, %v36_v22  ;;  %s393_s6 = scalar_lea.vmem %s357_s2, 4096  ;;  %p398_p1 = scmp.lt.s32.totalorder %s357_s2, %s357_s2 }
   0xb   :  { %169 = vmatprep.mubr.f32.mxu0 %v417_v5  ;;  %282 = vmatprep.mubr.f32.mxu1 %v417_v5  ;;  %p394_p0 = scmp.ne.s32.totalorder %s357_s2, %s393_s6  ;;  %p399_p2 = scmp.lt.s32.totalorder %s393_s6, %s393_s6 }
   0xc   :  { %v490_v28 = vrot.slane %v33_v25, %v37_v23  ;;  %v492_v29 = vrot.slane %v33_v25, %v45_v24  ;;  %v494_v30 = vrot.slane %v33_v25, %v41_v26  ;;  %v496_v31 = vrot.slane %v33_v25, %v49_v27 }
   0xd   :  { %p400_p3 = por %p399_p2, %p398_p1 }
   0xe   :  { %371 = vmatmul.mubr.msk.f32.gmra.mrb[4].mxu0 %vm59_vm1, %v25_v10  ;;  %381 = vmatmul.mubr.msk.f32.gmra.mrb[4].mxu1 %vm59_vm1, %v25_v10 }
   0xf   :  { %175 = vmatprep.mubr.f32.mxu0 %v417_v5  ;;  %288 = vmatprep.mubr.f32.mxu1 %v417_v5  ;;  %p401_p4 = pnand %p400_p3, %p394_p0 }
  0x12   :  { %372 = vmatmul.mubr.msk.f32.gmra.mrb[6].mxu0 %vm59_vm1, %v26_v12  ;;  %382 = vmatmul.mubr.msk.f32.gmra.mrb[6].mxu1 %vm59_vm1, %v26_v12 }
  0x13   :  { %181 = vmatprep.mubr.f32.mxu0 %v417_v5  ;;  %294 = vmatprep.mubr.f32.mxu1 %v417_v5 }
  0x16   :  { %373 = vmatmul.mubr.msk.f32.gmra.mrb[8].mxu0 %vm59_vm1, %v27_v14  ;;  %383 = vmatmul.mubr.msk.f32.gmra.mrb[8].mxu1 %vm59_vm1, %v27_v14 }
  0x17   :  { %187 = vmatprep.mubr.f32.mxu0 %v417_v5  ;;  %300 = vmatprep.mubr.f32.mxu1 %v417_v5 }
  0x1a   :  { %374 = vmatmul.mubr.msk.f32.gmra.mrb[10].mxu0 %vm59_vm1, %v28_v16  ;;  %384 = vmatmul.mubr.msk.f32.gmra.mrb[10].mxu1 %vm59_vm1, %v28_v16 }
  0x1b   :  { %193 = vmatprep.mubr.f32.mxu0 %v417_v5  ;;  %306 = vmatprep.mubr.f32.mxu1 %v417_v5 }
  0x1e   :  { %375 = vmatmul.mubr.msk.f32.gmra.mrb[12].mxu0 %vm59_vm1, %v29_v18  ;;  %385 = vmatmul.mubr.msk.f32.gmra.mrb[12].mxu1 %vm59_vm1, %v29_v18 }
  0x1f   :  { %199 = vmatprep.mubr.f32.mxu0 %v417_v5  ;;  %312 = vmatprep.mubr.f32.mxu1 %v417_v5 }
  0x22   :  { %376 = vmatmul.mubr.msk.f32.gmra.mrb[14].mxu0 %vm59_vm1, %v30_v20  ;;  %386 = vmatmul.mubr.msk.f32.gmra.mrb[14].mxu1 %vm59_vm1, %v30_v20 }
  0xd9   :  { %v159_v32 = vpop.f32.mrb[0].mxu0  ;;  %v272_v33 = vpop.f32.mrb[0].mxu1 }
  0xda   :  { %v160_v34 = vadd.f32 %v159_v32, %v490_v28  ;;  %v273_v35 = vadd.f32 %v272_v33, %v492_v29  ;;  %v161_v36 = vpop.f32.mrb[1].mxu0  ;;  %v274_v37 = vpop.f32.mrb[1].mxu1 }
  0xdb   :  { %v162_v38 = vadd.f32 %v161_v36, %v494_v30  ;;  %v275_v39 = vadd.f32 %v274_v37, %v496_v31 }
  0xdc   :  { %319 = vst [vmem:[#allocation2] sm:$0xff] %v160_v34  ;;  %321 = vst [vmem:[#allocation2 + $0x10] sm:$0xff] %v273_v35 }
  0xdd   :  { %320 = vst [vmem:[#allocation2 + $0x8] sm:$0xff] %v162_v38  ;;  %322 = vst [vmem:[#allocation2 + $0x18] sm:$0xff] %v275_v39  ;;  %v165_v40 = vpop.f32.mrb[2].mxu0  ;;  %v278_v41 = vpop.f32.mrb[2].mxu1 }
  0xde   :  { %v166_v42 = vadd.f32 %v165_v40, %v490_v28  ;;  %v279_v43 = vadd.f32 %v278_v41, %v492_v29  ;;  %v167_v44 = vpop.f32.mrb[3].mxu0  ;;  %v280_v45 = vpop.f32.mrb[3].mxu1 }
  0xdf   :  { %v168_v46 = vadd.f32 %v167_v44, %v494_v30  ;;  %v281_v47 = vadd.f32 %v280_v45, %v496_v31 }
  0xe0   :  { %323 = vst [vmem:[#allocation2 + $0x20] sm:$0xff] %v166_v42  ;;  %325 = vst [vmem:[#allocation2 + $0x30] sm:$0xff] %v279_v43 }
  0xe1   :  { %324 = vst [vmem:[#allocation2 + $0x28] sm:$0xff] %v168_v46  ;;  %326 = vst [vmem:[#allocation2 + $0x38] sm:$0xff] %v281_v47  ;;  %v171_v48 = vpop.f32.mrb[4].mxu0  ;;  %v284_v49 = vpop.f32.mrb[4].mxu1 }
  0xe2   :  { %v172_v50 = vadd.f32 %v171_v48, %v490_v28  ;;  %v285_v51 = vadd.f32 %v284_v49, %v492_v29  ;;  %v173_v52 = vpop.f32.mrb[5].mxu0  ;;  %v286_v53 = vpop.f32.mrb[5].mxu1 }
  0xe3   :  { %v174_v54 = vadd.f32 %v173_v52, %v494_v30  ;;  %v287_v55 = vadd.f32 %v286_v53, %v496_v31 }
  0xe4   :  { %327 = vst [vmem:[#allocation2 + $0x40] sm:$0xff] %v172_v50  ;;  %329 = vst [vmem:[#allocation2 + $0x50] sm:$0xff] %v285_v51 }
  0xe5   :  { %328 = vst [vmem:[#allocation2 + $0x48] sm:$0xff] %v174_v54  ;;  %330 = vst [vmem:[#allocation2 + $0x58] sm:$0xff] %v287_v55  ;;  %v177_v56 = vpop.f32.mrb[6].mxu0  ;;  %v290_v57 = vpop.f32.mrb[6].mxu1 }
  0xe6   :  { %v178_v58 = vadd.f32 %v177_v56, %v490_v28  ;;  %v291_v59 = vadd.f32 %v290_v57, %v492_v29  ;;  %v179_v60 = vpop.f32.mrb[7].mxu0  ;;  %v292_v61 = vpop.f32.mrb[7].mxu1 }
  0xe7   :  { %v180_v62 = vadd.f32 %v179_v60, %v494_v30  ;;  %v293_v63 = vadd.f32 %v292_v61, %v496_v31 }
  0xe8   :  { %331 = vst [vmem:[#allocation2 + $0x60] sm:$0xff] %v178_v58  ;;  %333 = vst [vmem:[#allocation2 + $0x70] sm:$0xff] %v291_v59 }
  0xe9   :  { %332 = vst [vmem:[#allocation2 + $0x68] sm:$0xff] %v180_v62  ;;  %334 = vst [vmem:[#allocation2 + $0x78] sm:$0xff] %v293_v63  ;;  %v183_v0 = vpop.f32.mrb[8].mxu0  ;;  %v296_v1 = vpop.f32.mrb[8].mxu1 }
  0xea   :  { %v184_v2 = vadd.f32 %v183_v0, %v490_v28  ;;  %v297_v3 = vadd.f32 %v296_v1, %v492_v29  ;;  %v185_v4 = vpop.f32.mrb[9].mxu0  ;;  %v298_v5 = vpop.f32.mrb[9].mxu1 }
  0xeb   :  { %v186_v6 = vadd.f32 %v185_v4, %v494_v30  ;;  %v299_v7 = vadd.f32 %v298_v5, %v496_v31 }
  0xec   :  { %335 = vst [vmem:[#allocation2 + $0x80] sm:$0xff] %v184_v2  ;;  %337 = vst [vmem:[#allocation2 + $0x90] sm:$0xff] %v297_v3 }
  0xed   :  { %336 = vst [vmem:[#allocation2 + $0x88] sm:$0xff] %v186_v6  ;;  %338 = vst [vmem:[#allocation2 + $0x98] sm:$0xff] %v299_v7  ;;  %v189_v8 = vpop.f32.mrb[10].mxu0  ;;  %v302_v9 = vpop.f32.mrb[10].mxu1 }
  0xee   :  { %v190_v10 = vadd.f32 %v189_v8, %v490_v28  ;;  %v303_v11 = vadd.f32 %v302_v9, %v492_v29  ;;  %v191_v12 = vpop.f32.mrb[11].mxu0  ;;  %v304_v13 = vpop.f32.mrb[11].mxu1 }
  0xef   :  { %v192_v14 = vadd.f32 %v191_v12, %v494_v30  ;;  %v305_v15 = vadd.f32 %v304_v13, %v496_v31 }
  0xf0   :  { %339 = vst [vmem:[#allocation2 + $0xa0] sm:$0xff] %v190_v10  ;;  %341 = vst [vmem:[#allocation2 + $0xb0] sm:$0xff] %v303_v11 }
  0xf1   :  { %340 = vst [vmem:[#allocation2 + $0xa8] sm:$0xff] %v192_v14  ;;  %342 = vst [vmem:[#allocation2 + $0xb8] sm:$0xff] %v305_v15  ;;  %v195_v16 = vpop.f32.mrb[12].mxu0  ;;  %v308_v17 = vpop.f32.mrb[12].mxu1 }
  0xf2   :  { %v196_v18 = vadd.f32 %v195_v16, %v490_v28  ;;  %v309_v19 = vadd.f32 %v308_v17, %v492_v29  ;;  %v197_v20 = vpop.f32.mrb[13].mxu0  ;;  %v310_v21 = vpop.f32.mrb[13].mxu1 }
  0xf3   :  { %v198_v22 = vadd.f32 %v197_v20, %v494_v30  ;;  %v311_v23 = vadd.f32 %v310_v21, %v496_v31 }
  0xf4   :  { %343 = vst [vmem:[#allocation2 + $0xc0] sm:$0xff] %v196_v18  ;;  %345 = vst [vmem:[#allocation2 + $0xd0] sm:$0xff] %v309_v19 }
  0xf5   :  { %344 = vst [vmem:[#allocation2 + $0xc8] sm:$0xff] %v198_v22  ;;  %346 = vst [vmem:[#allocation2 + $0xd8] sm:$0xff] %v311_v23  ;;  %v201_v24 = vpop.f32.mrb[14].mxu0  ;;  %v314_v25 = vpop.f32.mrb[14].mxu1 }
  0xf6   :  { %v202_v26 = vadd.f32 %v201_v24, %v490_v28  ;;  %v315_v27 = vadd.f32 %v314_v25, %v492_v29  ;;  %v203_v32 = vpop.f32.mrb[15].mxu0  ;;  %v316_v33 = vpop.f32.mrb[15].mxu1 }
  0xf7   :  { %v204_v34 = vadd.f32 %v203_v32, %v494_v30  ;;  %v317_v35 = vadd.f32 %v316_v33, %v496_v31 }
  0xf8   :  { %347 = vst [vmem:[#allocation2 + $0xe0] sm:$0xff] %v202_v26  ;;  %349 = vst [vmem:[#allocation2 + $0xf0] sm:$0xff] %v315_v27 }
  0xf9   :  { %348 = vst [vmem:[#allocation2 + $0xe8] sm:$0xff] %v204_v34  ;;  %350 = vst [vmem:[#allocation2 + $0xf8] sm:$0xff] %v317_v35 }
  0xfa   :  { %404 = shalt.err (!%p401_p4)
}
  0xfb   :  { %s405_s9 = scalar_lea.hbm %s545_s3, 4096 }
  0xfc   :  { %p406_p5 = scmp.ne.s32.totalorder %s545_s3, %s405_s9  ;;  %p409_p6 = scmp.lt.u32.totalorder %s405_s9, %s545_s3 }
  0xfe   :  { %p411_p7 = pnand %p409_p6, %p406_p5 }
 0x100   :  { %414 = shalt.err (!%p411_p7)
}
 0x101   :  { %s419_s14 = smov 512   ;;  %s420_s15 = smov 32  }
 0x102   :  { %362 = dma.vmem_to_hbm [thread:$0]  %s357_s2, 4096, %s545_s3, [#allocation3], %s419_s14, %s419_s14, %s420_s15  }
 0x103   :  { %415 = dma.done.wait [#allocation3], 4096  }
 0x104   :  { %416 = vsyncadd [#allocation3], 4294963200 }
 0x105   :  { %366 = vsyncpa [#allocation3], 1 }

</bundles_post_ra>
